<compile_context>
chip_gen: v7x
topology: tpu7x:2x2x1
jax: 0.10.0
libtpu: 0.0.40
codegen_flags: <defaults>
</compile_context>

<pallas_src>
import jax
import jax.numpy as jnp
from jax.experimental import pallas as pl
from jax.experimental.pallas import tpu as pltpu


# ----------------------------------------------------------------------------- kernel
def head_fc_kernel(a_ref, b_ref,
                   w1_ref, b1_ref,
                   w2_ref, b2_ref,
                   wo8_ref, bo_ref,
                   out_ref):
    # (featsA - featsB)^2 in the feature dtype (bf16 in production: halves HBM
    # traffic and the large VMEM temporaries).  bn0 is folded into w1/b1.
    d = a_ref[...] - b_ref[...]
    x = (d * d).astype(w1_ref.dtype)

    # fc1 (bn0 folded on the input side, bn1 on the output side) -> relu.
    # bf16 operands -> single-pass MXU on v6e/v7x; accumulate in f32.
    h = jnp.dot(x, w1_ref[...], preferred_element_type=jnp.float32) + b1_ref[...]
    h = jnp.maximum(h, 0.0)

    # fc2 (bn2 folded on the output side) -> relu.
    h = jnp.dot(h.astype(w2_ref.dtype), w2_ref[...],
                preferred_element_type=jnp.float32) + b2_ref[...]
    h = jnp.maximum(h, 0.0)

    # Final N=1 head, produced lane-major:  y[r, n] = sum_k wo8[r, k] * h[n, k].
    # wo8 is the single out-weight row replicated to 8 sublanes (avoids an M=1
    # MXU edge case); the (8, tile) result is a dense vreg slab, so stores are
    # unmasked and the writeback DMA is one fat row-block instead of a skinny
    # column.  NT dimension numbers, same pattern as the official flash kernel.
    y = jax.lax.dot_general(
        wo8_ref[...].astype(jnp.float32), h,
        dimension_numbers=(((1,), (1,)), ((), ())),
        preferred_element_type=jnp.float32)
    out_ref[...] = jax.nn.sigmoid(y + bo_ref[...])


# ----------------------------------------------------------------------------- wrapper
def _round_up(x, m):
    return ((x + m - 1) // m) * m


def head_fc_forward(featsA, featsB, folded_params, *, tile_b=None):
    """folded_params = (w1f, b1f, w2f, b2f, wo8, bo) from fold_head_fc_params."""
    B, F = featsA.shape
    w1f, b1f, w2f, b2f, wo8, bo = folded_params
    mid0, mid1 = w1f.shape[1], w2f.shape[1]

    # ---- batch tiling -------------------------------------------------------
    # bf16 features halve per-row HBM bytes -> allow a 2x larger tile at the same
    # VMEM budget.  Tiles that split the batch are multiples of 128 (keeps the
    # (tile, 512) input blocks sublane-aligned and the (8, tile) output block
    # lane-aligned); a tile >= B collapses to the full batch, which is always a
    # legal block (block == full dim).  When B is large enough we force >= 2 grid
    # steps so v7x can shard the "parallel" batch axis across its 2 TensorCores.
    cap = 4096 if featsA.dtype.itemsize <= 2 else 2048
    req = cap if tile_b is None else max(1, min(int(tile_b), cap))
    two_step = _round_up(pl.cdiv(B, 2), 128)
    tile = _round_up(min(req, two_step), 128)
    if tile >= B:
        tile = B
    num_tiles = pl.cdiv(B, tile)
    padded = num_tiles * tile

    def batch_block(shape):              # batch-tiled operand
        return pl.BlockSpec(shape, lambda i: (i, 0))

    def resident(shape):                 # constant index map: DMA'd once, VMEM-resident
        return pl.BlockSpec(shape, lambda i: (0, 0))

    # Advisory cost estimate (matmuls + elementwise prologue; one sigmoid per row).
    flops = 2 * B * (F * mid0 + mid0 * mid1 + 8 * mid1) + 3 * B * F
    bytes_accessed = (2 * B * F * featsA.dtype.itemsize
                      + 8 * padded * 4
                      + sum(int(p.size) * p.dtype.itemsize for p in folded_params))

    out = pl.pallas_call(
        head_fc_kernel,
        out_shape=jax.ShapeDtypeStruct((8, padded), jnp.float32),
        grid_spec=pltpu.PrefetchScalarGridSpec(
            num_scalar_prefetch=0,
            grid=(num_tiles,),
            in_specs=[
                batch_block((tile, F)),      # featsA
                batch_block((tile, F)),      # featsB
                resident((F, mid0)),         # w1 (bn0 + bn1 folded), bf16
                resident((1, mid0)),         # b1 (folded), f32
                resident((mid0, mid1)),      # w2 (bn2 folded), bf16
                resident((1, mid1)),         # b2 (folded), f32
                resident((8, mid1)),         # out weight row replicated to 8 sublanes
                resident((1, 1)),            # out bias
            ],
            out_specs=pl.BlockSpec((8, tile), lambda i: (0, i)),
        ),
        compiler_params=pltpu.CompilerParams(
            dimension_semantics=("parallel",),       # v7x: shard batch tiles over 2 TCs
            vmem_limit_bytes=48 * 1024 * 1024,       # <= v7x 64 MiB; overrides v5e 16 MiB default
        ),
        cost_estimate=pl.CostEstimate(
            flops=flops, transcendentals=B, bytes_accessed=bytes_accessed),
    )(featsA, featsB, w1f, b1f, w2f, b2f, wo8, bo)

    # Row 0 of the lane-dense slab holds the per-row outputs; drop tile padding.
    return out[0, :B].reshape(B, 1)


# ----------------------------------------------------------------------------- params
def make_head_fc_params(key, in_features=512, mid=(128, 32), eps=1e-5):
    """Deterministic synthetic parameters mirroring headFC.__init__ shapes.

    Returns *raw* (unfolded) params:
      (s0, o0, w1, b1, s1, o1, w2, b2, s2, o2, wo, bo)
    where each BN is already reduced to eval-mode per-feature scale/offset.
    """
    ks = jax.random.split(key, 18)

    def linear(kw, kb, fan_in, fan_out):
        bound = 1.0 / jnp.sqrt(fan_in)
        w = jax.random.uniform(kw, (fan_in, fan_out), jnp.float32, -bound, bound)
        b = jax.random.uniform(kb, (1, fan_out), jnp.float32, -bound, bound)
        return w, b

    def bn(kg, kb, km, kv, n):
        gamma = 1.0 + 0.1 * jax.random.normal(kg, (n,), jnp.float32)
        beta = 0.1 * jax.random.normal(kb, (n,), jnp.float32)
        mean = 0.1 * jax.random.normal(km, (n,), jnp.float32)
        var = jnp.abs(1.0 + 0.1 * jax.random.normal(kv, (n,), jnp.float32))
        scale = gamma / jnp.sqrt(var + eps)
        offset = beta - mean * scale
        return scale.reshape(1, n), offset.reshape(1, n)

    s0, o0 = bn(ks[0], ks[1], ks[2], ks[3], in_features)
    w1, b1 = linear(ks[4], ks[5], in_features, mid[0])
    s1, o1 = bn(ks[6], ks[7], ks[8], ks[9], mid[0])
    w2, b2 = linear(ks[10], ks[11], mid[0], mid[1])
    s2, o2 = bn(ks[12], ks[13], ks[14], ks[15], mid[1])
    wo, bo = linear(ks[16], ks[17], mid[1], 1)
    return (s0, o0, w1, b1, s1, o1, w2, b2, s2, o2, wo, bo)


def fold_head_fc_params(raw, param_dtype=jnp.bfloat16):
    """Host-side BN folding: bn0 -> fc1 input side, bn1 -> fc1 output side,
    bn2 -> fc2 output side.  Matmul weights are cast to `param_dtype` (bf16 by
    default for single-pass MXU); biases and the tiny out-head stay f32."""
    s0, o0, w1, b1, s1, o1, w2, b2, s2, o2, wo, bo = raw
    w1f = (s0[0][:, None] * w1) * s1[0][None, :]                # (F, mid0)
    b1f = ((b1[0] + o0[0] @ w1) * s1[0] + o1[0]).reshape(1, -1)
    w2f = w2 * s2[0][None, :]                                   # (mid0, mid1)
    b2f = (b2[0] * s2[0] + o2[0]).reshape(1, -1)
    wo8 = jnp.tile(wo.T, (8, 1))                                # (8, mid1) replicated row
    return (w1f.astype(param_dtype), b1f.astype(jnp.float32),
            w2f.astype(param_dtype), b2f.astype(jnp.float32),
            wo8.astype(jnp.float32), bo.astype(jnp.float32))


def head_fc_reference(featsA, featsB, raw):
    """Plain-JAX reference using the *unfolded* params (original op order)."""
    s0, o0, w1, b1, s1, o1, w2, b2, s2, o2, wo, bo = raw
    x = (featsA - featsB) ** 2
    x = x * s0 + o0
    h = jnp.maximum((x @ w1 + b1) * s1 + o1, 0.0)
    h = jnp.maximum((h @ w2 + b2) * s2 + o2, 0.0)
    return jax.nn.sigmoid(h @ wo + bo)


# ----------------------------------------------------------------------------- test
if __name__ == "__main__":
    in_features = 512
    mid = (128, 32)
    batch = 8

    key = jax.random.PRNGKey(0)
    ka, kb, kp = jax.random.split(key, 3)
    featsA = jax.random.normal(ka, (batch, in_features), jnp.float32)
    featsB = jax.random.normal(kb, (batch, in_features), jnp.float32)
    raw_params = make_head_fc_params(kp, in_features=in_features, mid=mid)

    # --- exactness check: f32 features + f32 folded params (validates folding) ---
    folded_f32 = fold_head_fc_params(raw_params, param_dtype=jnp.float32)
    out_f32 = jax.block_until_ready(head_fc_forward(featsA, featsB, folded_f32))
    ref = head_fc_reference(featsA, featsB, raw_params)
    assert out_f32.shape == (batch, 1)
    assert jnp.allclose(out_f32, ref, atol=2e-5, rtol=1e-4), (
        f"f32 path mismatch, max abs err {jnp.max(jnp.abs(out_f32 - ref))}")

    # --- production path: bf16 features in HBM + bf16 MXU weights -------------
    fa16 = featsA.astype(jnp.bfloat16)
    fb16 = featsB.astype(jnp.bfloat16)
    folded_bf16 = fold_head_fc_params(raw_params, param_dtype=jnp.bfloat16)
    out_bf16 = jax.block_until_ready(head_fc_forward(fa16, fb16, folded_bf16))
    ref16 = head_fc_reference(fa16.astype(jnp.float32),
                              fb16.astype(jnp.float32), raw_params)
    assert out_bf16.shape == (batch, 1)
    assert jnp.allclose(out_bf16, ref16, atol=3e-2), (
        f"bf16 path mismatch, max abs err {jnp.max(jnp.abs(out_bf16 - ref16))}")

    print("KERNEL_OK")
</pallas_src>

<mosaic_0001>
module attributes {stable_mosaic.version = 11 : i64} {
  func.func @head_fc_kernel(%arg0: i32, %arg1: memref<8x512xf32, #tpu.memory_space<vmem>>, %arg2: memref<8x512xf32, #tpu.memory_space<vmem>>, %arg3: memref<512x128xf32, #tpu.memory_space<vmem>>, %arg4: memref<1x128xf32, #tpu.memory_space<vmem>>, %arg5: memref<128x32xf32, #tpu.memory_space<vmem>>, %arg6: memref<1x32xf32, #tpu.memory_space<vmem>>, %arg7: memref<8x32xf32, #tpu.memory_space<vmem>>, %arg8: memref<1x1xf32, #tpu.memory_space<vmem>>, %arg9: memref<8x8xf32, #tpu.memory_space<vmem>>) attributes {dimension_semantics = [#tpu.dimension_semantics<parallel>], iteration_bounds = array<i64: 1>, scalar_prefetch = 0 : i64, scratch_operands = 0 : i64, tpu.core_type = #tpu.core_type<tc>, window_params = [{transform_indices = @transform_0, window_bounds = array<i64: 8, 512>}, {transform_indices = @transform_1, window_bounds = array<i64: 8, 512>}, {pipeline_mode = #tpu.pipeline_mode<synchronous>, transform_indices = @transform_2, window_bounds = array<i64: 512, 128>}, {pipeline_mode = #tpu.pipeline_mode<synchronous>, transform_indices = @transform_3, window_bounds = array<i64: 1, 128>}, {pipeline_mode = #tpu.pipeline_mode<synchronous>, transform_indices = @transform_4, window_bounds = array<i64: 128, 32>}, {pipeline_mode = #tpu.pipeline_mode<synchronous>, transform_indices = @transform_5, window_bounds = array<i64: 1, 32>}, {pipeline_mode = #tpu.pipeline_mode<synchronous>, transform_indices = @transform_6, window_bounds = array<i64: 8, 32>}, {pipeline_mode = #tpu.pipeline_mode<synchronous>, transform_indices = @transform_7, window_bounds = array<i64: 1, 1>}, {transform_indices = @transform_8, window_bounds = array<i64: 8, 8>}]} {
    %c0 = arith.constant 0 : index
    %c0_0 = arith.constant 0 : index
    %0 = vector.load %arg1[%c0, %c0_0] : memref<8x512xf32, #tpu.memory_space<vmem>>, vector<8x512xf32>
    %c0_1 = arith.constant 0 : index
    %c0_2 = arith.constant 0 : index
    %1 = vector.load %arg2[%c0_1, %c0_2] : memref<8x512xf32, #tpu.memory_space<vmem>>, vector<8x512xf32>
    %2 = arith.subf %0, %1 : vector<8x512xf32>
    %3 = arith.mulf %2, %2 : vector<8x512xf32>
    %c0_3 = arith.constant 0 : index
    %c0_4 = arith.constant 0 : index
    %4 = vector.load %arg3[%c0_3, %c0_4] : memref<512x128xf32, #tpu.memory_space<vmem>>, vector<512x128xf32>
    %cst = arith.constant dense<0.000000e+00> : vector<8x128xf32>
    %5 = tpu.matmul %3, %4, %cst {dimension_numbers = #tpu.dot_dimension_numbers<[1], [0], [0], [1], [0, 0, 1, 1], [], []>} : vector<8x512xf32>, vector<512x128xf32>, vector<8x128xf32> -> vector<8x128xf32>
    %c0_5 = arith.constant 0 : index
    %c0_6 = arith.constant 0 : index
    %6 = vector.load %arg4[%c0_5, %c0_6] : memref<1x128xf32, #tpu.memory_space<vmem>>, vector<1x128xf32>
    %7 = vector.broadcast %6 : vector<1x128xf32> to vector<8x128xf32>
    %8 = arith.addf %5, %7 : vector<8x128xf32>
    %cst_7 = arith.constant 0.000000e+00 : f32
    %9 = vector.broadcast %cst_7 : f32 to vector<8x128xf32>
    %10 = arith.maximumf %8, %9 : vector<8x128xf32>
    %c0_8 = arith.constant 0 : index
    %c0_9 = arith.constant 0 : index
    %11 = vector.load %arg5[%c0_8, %c0_9] : memref<128x32xf32, #tpu.memory_space<vmem>>, vector<128x32xf32>
    %cst_10 = arith.constant dense<0.000000e+00> : vector<8x32xf32>
    %12 = tpu.matmul %10, %11, %cst_10 {dimension_numbers = #tpu.dot_dimension_numbers<[1], [0], [0], [1], [0, 0, 1, 1], [], []>} : vector<8x128xf32>, vector<128x32xf32>, vector<8x32xf32> -> vector<8x32xf32>
    %c0_11 = arith.constant 0 : index
    %c0_12 = arith.constant 0 : index
    %13 = vector.load %arg6[%c0_11, %c0_12] : memref<1x32xf32, #tpu.memory_space<vmem>>, vector<1x32xf32>
    %14 = vector.broadcast %13 : vector<1x32xf32> to vector<8x32xf32>
    %15 = arith.addf %12, %14 : vector<8x32xf32>
    %cst_13 = arith.constant 0.000000e+00 : f32
    %16 = vector.broadcast %cst_13 : f32 to vector<8x32xf32>
    %17 = arith.maximumf %15, %16 : vector<8x32xf32>
    %c0_14 = arith.constant 0 : index
    %c0_15 = arith.constant 0 : index
    %18 = vector.load %arg7[%c0_14, %c0_15] : memref<8x32xf32, #tpu.memory_space<vmem>>, vector<8x32xf32>
    %cst_16 = arith.constant dense<0.000000e+00> : vector<8x8xf32>
    %19 = tpu.matmul %18, %17, %cst_16 {dimension_numbers = #tpu.dot_dimension_numbers<[1], [1], [0], [0], [0, 0, 1, 0], [], []>} : vector<8x32xf32>, vector<8x32xf32>, vector<8x8xf32> -> vector<8x8xf32>
    %c0_17 = arith.constant 0 : index
    %c0_18 = arith.constant 0 : index
    %20 = vector.load %arg8[%c0_17, %c0_18] : memref<1x1xf32, #tpu.memory_space<vmem>>, vector<1x1xf32>
    %21 = vector.broadcast %20 : vector<1x1xf32> to vector<8x8xf32>
    %22 = arith.addf %19, %21 : vector<8x8xf32>
    %23 = arith.negf %22 : vector<8x8xf32>
    %24 = math.exp %23 : vector<8x8xf32>
    %cst_19 = arith.constant 1.000000e+00 : f32
    %25 = vector.broadcast %cst_19 : f32 to vector<8x8xf32>
    %26 = arith.addf %25, %24 : vector<8x8xf32>
    %27 = arith.divf %25, %26 : vector<8x8xf32>
    %c0_20 = arith.constant 0 : index
    %c0_21 = arith.constant 0 : index
    %28 = vector.load %arg9[%c0_20, %c0_21] : memref<8x8xf32, #tpu.memory_space<vmem>>, vector<8x8xf32>
    tpu.vector_store %arg9[%c0_20, %c0_21], %27 {strides = array<i32>} : memref<8x8xf32, #tpu.memory_space<vmem>>, vector<8x8xf32>,
    return
  }
  func.func @transform_0(%arg0: i32) -> (i32, i32) {
    %c0_i32 = arith.constant 0 : i32
    %c0_i32_0 = arith.constant 0 : i32
    return %arg0, %c0_i32 : i32, i32
  }
  func.func @transform_1(%arg0: i32) -> (i32, i32) {
    %c0_i32 = arith.constant 0 : i32
    %c0_i32_0 = arith.constant 0 : i32
    return %arg0, %c0_i32 : i32, i32
  }
  func.func @transform_2(%arg0: i32) -> (i32, i32) {
    %c0_i32 = arith.constant 0 : i32
    %c0_i32_0 = arith.constant 0 : i32
    %c0_i32_1 = arith.constant 0 : i32
    return %c0_i32, %c0_i32_0 : i32, i32
  }
  func.func @transform_3(%arg0: i32) -> (i32, i32) {
    %c0_i32 = arith.constant 0 : i32
    %c0_i32_0 = arith.constant 0 : i32
    %c0_i32_1 = arith.constant 0 : i32
    return %c0_i32, %c0_i32_0 : i32, i32
  }
  func.func @transform_4(%arg0: i32) -> (i32, i32) {
    %c0_i32 = arith.constant 0 : i32
    %c0_i32_0 = arith.constant 0 : i32
    %c0_i32_1 = arith.constant 0 : i32
    return %c0_i32, %c0_i32_0 : i32, i32
  }
  func.func @transform_5(%arg0: i32) -> (i32, i32) {
    %c0_i32 = arith.constant 0 : i32
    %c0_i32_0 = arith.constant 0 : i32
    %c0_i32_1 = arith.constant 0 : i32
    return %c0_i32, %c0_i32_0 : i32, i32
  }
  func.func @transform_6(%arg0: i32) -> (i32, i32) {
    %c0_i32 = arith.constant 0 : i32
    %c0_i32_0 = arith.constant 0 : i32
    %c0_i32_1 = arith.constant 0 : i32
    return %c0_i32, %c0_i32_0 : i32, i32
  }
  func.func @transform_7(%arg0: i32) -> (i32, i32) {
    %c0_i32 = arith.constant 0 : i32
    %c0_i32_0 = arith.constant 0 : i32
    %c0_i32_1 = arith.constant 0 : i32
    return %c0_i32, %c0_i32_0 : i32, i32
  }
  func.func @transform_8(%arg0: i32) -> (i32, i32) {
    %c0_i32 = arith.constant 0 : i32
    %c0_i32_0 = arith.constant 0 : i32
    return %c0_i32, %arg0 : i32, i32
  }
}

</mosaic_0001>

<bundles_post_ra>
// kernel: tpu_custom_call.1
= control target key start
LH: loop header
LB: loop body
LE: loop exit
PB: predicated region body
PF: predicated region fallthrough
CT: control target
= control target key end

     0   :  { %s924_s0 = inlined_call_operand.vmem [shape: f32[8,512], index: 0, kind: input, shape index: {}]   ;;  %s925_s1 = inlined_call_operand.vmem [shape: f32[8,512], index: 1, kind: input, shape index: {}]   ;;  %s926_s2 = inlined_call_operand.hbm [shape: f32[512,128], index: 2, kind: input, shape index: {}]   ;;  %s927_s3 = inlined_call_operand.vmem [shape: f32[1,128], index: 3, kind: input, shape index: {}]   ;;  %s928_s4 = inlined_call_operand.vmem [shape: f32[128,32], index: 4, kind: input, shape index: {}]   ;;  %s929_s5 = inlined_call_operand.vmem [shape: f32[1,32], index: 5, kind: input, shape index: {}]   ;;  %s930_s6 = inlined_call_operand.vmem [shape: f32[8,32], index: 6, kind: input, shape index: {}]   ;;  %s931_s7 = inlined_call_operand.<no memory space> [shape: f32[1,1], index: 7, kind: input, shape index: {}]   ;;  %s932_s8 = inlined_call_operand.hbm [shape: f32[8,8], index: 8, kind: output, shape index: {}]  }
   0x1   :  { %v13_v0 = vstv %s931_s7 }
   0x2   :  { %14 = vst [vmem:[#allocation2] sm:$0x1] %v13_v0 }
   0x3   :  { %15 = vsyncpa [#allocation4], 0 }
   0x4   :  { %16 = vsyncpa [#allocation5], 0  ;;  %s763_s29 = smov [#allocation3]   ;;  %s715_s11 = scalar_lea.hbm %s926_s2, 8192 }
   0x5   :  { %s26_s30 = sshll.u32 %s763_s29, 4  ;;  %p716_p0 = scmp.ne.s32.totalorder %s926_s2, %s715_s11  ;;  %s27_s30 = int_to_ptr.vmem [resolvable:$true] %s26_s30 }
   0x6   :  { %p719_p1 = scmp.lt.u32.totalorder %s715_s11, %s926_s2 }
   0x8   :  { %p721_p2 = pnand %p719_p1, %p716_p0 }
   0xa   :  { %724 = shalt.err (!%p721_p2)
}
   0xb   :  { %s725_s7 = scalar_lea.vmem %s27_s30, 8192  ;;  %p730_p4 = scmp.lt.s32.totalorder %s27_s30, %s27_s30 }
   0xc   :  { %p726_p3 = scmp.ne.s32.totalorder %s27_s30, %s725_s7  ;;  %p731_p5 = scmp.lt.s32.totalorder %s725_s7, %s725_s7 }
   0xe   :  { %p732_p6 = por %p731_p5, %p730_p4 }
  0x10   :  { %p733_p7 = pnand %p732_p6, %p726_p3 }
  0x12   :  { %736 = shalt.err (!%p733_p7)
}
  0x13   :  { %s764_s16 = smov 128   ;;  %s765_s17 = smov 8  }
  0x14   :  { %32 = dma.hbm_to_vmem [thread:$0]  %s926_s2, 8192, %s27_s30, [#allocation4], %s764_s16, %s764_s16, %s765_s17  }
  0x15   :  { %759 = dma.done.wait [#allocation4], 8192  }
  0x16   :  { %760 = vsyncadd [#allocation4], 4294959104  ;;  %v78_v1 = vld [vmem:[#allocation3 + $0x80] sm:$0xff]  ;;  %v79_v2 = vld [vmem:[#allocation3 + $0x88] sm:$0xff]  ;;  %vm767_vm0 = vmmov 0   ;;  %vm379_vm1 = vcmask 261120  }
  0x17   :  { %v62_v3 = vld [vmem:[#allocation3] sm:$0xff]  ;;  %v614_v4 = vpack.c.bf16 %v79_v2, %v78_v1  ;;  %v63_v5 = vld [vmem:[#allocation3 + $0x8] sm:$0xff]  ;;  %v80_v12 = vld [vmem:[#allocation3 + $0x90] sm:$0xff]  ;;  %vm462_vm2 = vcmask 64512  }
  0x18   :  { %v110_v6 = vld [vmem:[#allocation3 + $0x180] sm:$0xff]  ;;  %v111_v7 = vld [vmem:[#allocation3 + $0x188] sm:$0xff]  ;;  %v616_v8 = vpack.c.bf16 %v63_v5, %v62_v3  ;;  %v81_v14 = vld [vmem:[#allocation3 + $0x98] sm:$0xff] }
  0x19   :  { %v646_v9 = vpack.c.bf16 %v111_v7, %v110_v6  ;;  %v94_v10 = vld [vmem:[#allocation3 + $0x100] sm:$0xff]  ;;  %v95_v11 = vld [vmem:[#allocation3 + $0x108] sm:$0xff]  ;;  %615 = vmatprep.subr.bf16.mxu0 %v614_v4  ;;  %v64_v15 = vld [vmem:[#allocation3 + $0x10] sm:$0xff]  ;;  %v618_v17 = vpack.c.bf16 %v81_v14, %v80_v12 }
  0x1a   :  { %v648_v13 = vpack.c.bf16 %v95_v11, %v94_v10  ;;  %v65_v16 = vld [vmem:[#allocation3 + $0x18] sm:$0xff]  ;;  %617 = vmatpush3.bf16.msra.mxu0 %v616_v8  ;;  %v112_v19 = vld [vmem:[#allocation3 + $0x190] sm:$0xff]  ;;  %v82_v24 = vld [vmem:[#allocation3 + $0xa0] sm:$0xff] }
  0x1b   :  { %647 = vmatprep.subr.bf16.mxu1 %v646_v9  ;;  %v620_v18 = vpack.c.bf16 %v65_v16, %v64_v15  ;;  %v113_v20 = vld [vmem:[#allocation3 + $0x198] sm:$0xff]  ;;  %v96_v21 = vld [vmem:[#allocation3 + $0x110] sm:$0xff]  ;;  %v83_v25 = vld [vmem:[#allocation3 + $0xa8] sm:$0xff]  ;;  %619 = vmatprep.subr.bf16.mxu0 %v618_v17 }
  0x1c   :  { %649 = vmatpush3.bf16.msra.mxu1 %v648_v13  ;;  %v650_v22 = vpack.c.bf16 %v113_v20, %v112_v19  ;;  %v97_v23 = vld [vmem:[#allocation3 + $0x118] sm:$0xff]  ;;  %v622_v27 = vpack.c.bf16 %v83_v25, %v82_v24  ;;  %v66_v28 = vld [vmem:[#allocation3 + $0x20] sm:$0xff]  ;;  %v67_v29 = vld [vmem:[#allocation3 + $0x28] sm:$0xff] }
  0x1d   :  { %v652_v26 = vpack.c.bf16 %v97_v23, %v96_v21  ;;  %v114_v30 = vld [vmem:[#allocation3 + $0x1a0] sm:$0xff]  ;;  %v115_v31 = vld [vmem:[#allocation3 + $0x1a8] sm:$0xff]  ;;  %v624_v34 = vpack.c.bf16 %v67_v29, %v66_v28  ;;  %v84_v36 = vld [vmem:[#allocation3 + $0xb0] sm:$0xff] }
  0x1e   :  { %651 = vmatprep.subr.bf16.mxu1 %v650_v22  ;;  %v98_v32 = vld [vmem:[#allocation3 + $0x120] sm:$0xff]  ;;  %v99_v33 = vld [vmem:[#allocation3 + $0x128] sm:$0xff]  ;;  %621 = vmatpush3.bf16.msra.mxu0 %v620_v18  ;;  %v654_v35 = vpack.c.bf16 %v115_v31, %v114_v30  ;;  %v85_v37 = vld [vmem:[#allocation3 + $0xb8] sm:$0xff] }
  0x1f   :  { %v68_v38 = vld [vmem:[#allocation3 + $0x30] sm:$0xff]  ;;  %623 = vmatprep.subr.bf16.mxu0 %v622_v27  ;;  %v656_v39 = vpack.c.bf16 %v99_v33, %v98_v32  ;;  %v626_v40 = vpack.c.bf16 %v85_v37, %v84_v36  ;;  %v69_v41 = vld [vmem:[#allocation3 + $0x38] sm:$0xff]  ;;  %v86_v47 = vld [vmem:[#allocation3 + $0xc0] sm:$0xff] }
  0x20   :  { %653 = vmatpush3.bf16.msra.mxu1 %v652_v26  ;;  %v116_v42 = vld [vmem:[#allocation3 + $0x1b0] sm:$0xff]  ;;  %v117_v43 = vld [vmem:[#allocation3 + $0x1b8] sm:$0xff]  ;;  %v87_v48 = vld [vmem:[#allocation3 + $0xc8] sm:$0xff]  ;;  %v628_v49 = vpack.c.bf16 %v69_v41, %v68_v38 }
  0x21   :  { %655 = vmatprep.subr.bf16.mxu1 %v654_v35  ;;  %v658_v44 = vpack.c.bf16 %v117_v43, %v116_v42  ;;  %v100_v45 = vld [vmem:[#allocation3 + $0x130] sm:$0xff]  ;;  %v101_v46 = vld [vmem:[#allocation3 + $0x138] sm:$0xff]  ;;  %v118_v50 = vld [vmem:[#allocation3 + $0x1c0] sm:$0xff]  ;;  %v630_v53 = vpack.c.bf16 %v87_v48, %v86_v47 }
  0x22   :  { %625 = vmatpush3.bf16.msra.mxu0 %v624_v34  ;;  %v119_v51 = vld [vmem:[#allocation3 + $0x1c8] sm:$0xff]  ;;  %v660_v52 = vpack.c.bf16 %v101_v46, %v100_v45  ;;  %v70_v54 = vld [vmem:[#allocation3 + $0x40] sm:$0xff]  ;;  %v88_v59 = vld [vmem:[#allocation3 + $0xd0] sm:$0xff] }
  0x23   :  { %627 = vmatprep.subr.bf16.mxu0 %v626_v40  ;;  %v71_v55 = vld [vmem:[#allocation3 + $0x48] sm:$0xff]  ;;  %v102_v56 = vld [vmem:[#allocation3 + $0x140] sm:$0xff]  ;;  %v662_v57 = vpack.c.bf16 %v119_v51, %v118_v50  ;;  %v89_v60 = vld [vmem:[#allocation3 + $0xd8] sm:$0xff] }
  0x24   :  { %657 = vmatpush3.bf16.msra.mxu1 %v656_v39  ;;  %v103_v58 = vld [vmem:[#allocation3 + $0x148] sm:$0xff]  ;;  %v120_v61 = vld [vmem:[#allocation3 + $0x1d0] sm:$0xff]  ;;  %v121_v62 = vld [vmem:[#allocation3 + $0x1d8] sm:$0xff]  ;;  %v632_v63 = vpack.c.bf16 %v71_v55, %v70_v54  ;;  %v634_v1 = vpack.c.bf16 %v89_v60, %v88_v59 }
  0x25   :  { %659 = vmatprep.subr.bf16.mxu1 %v658_v44  ;;  %v664_v0 = vpack.c.bf16 %v103_v58, %v102_v56  ;;  %v72_v2 = vld [vmem:[#allocation3 + $0x50] sm:$0xff]  ;;  %v73_v3 = vld [vmem:[#allocation3 + $0x58] sm:$0xff]  ;;  %v666_v5 = vpack.c.bf16 %v121_v62, %v120_v61  ;;  %v90_v7 = vld [vmem:[#allocation3 + $0xe0] sm:$0xff] }
  0x26   :  { %629 = vmatpush3.bf16.msra.mxu0 %v628_v49  ;;  %v104_v4 = vld [vmem:[#allocation3 + $0x150] sm:$0xff]  ;;  %v105_v6 = vld [vmem:[#allocation3 + $0x158] sm:$0xff]  ;;  %v91_v8 = vld [vmem:[#allocation3 + $0xe8] sm:$0xff]  ;;  %v636_v11 = vpack.c.bf16 %v73_v3, %v72_v2 }
  0x27   :  { %631 = vmatprep.subr.bf16.mxu0 %v630_v53  ;;  %v122_v9 = vld [vmem:[#allocation3 + $0x1e0] sm:$0xff]  ;;  %v123_v10 = vld [vmem:[#allocation3 + $0x1e8] sm:$0xff]  ;;  %v668_v15 = vpack.c.bf16 %v105_v6, %v104_v4  ;;  %v638_v16 = vpack.c.bf16 %v91_v8, %v90_v7  ;;  %v92_v21 = vld [vmem:[#allocation3 + $0xf0] sm:$0xff] }
  0x28   :  { %661 = vmatpush3.bf16.msra.mxu1 %v660_v52  ;;  %v74_v12 = vld [vmem:[#allocation3 + $0x60] sm:$0xff]  ;;  %v75_v13 = vld [vmem:[#allocation3 + $0x68] sm:$0xff]  ;;  %v670_v20 = vpack.c.bf16 %v123_v10, %v122_v9  ;;  %v93_v22 = vld [vmem:[#allocation3 + $0xf8] sm:$0xff]  ;;  %v766_v52 = vmov 0.0|0.0   ;;  %v768_v10 = vmov 0.0  }
  0x29   :  { %663 = vmatprep.subr.bf16.mxu1 %v662_v57  ;;  %v106_v14 = vld [vmem:[#allocation3 + $0x160] sm:$0xff]  ;;  %v107_v17 = vld [vmem:[#allocation3 + $0x168] sm:$0xff]  ;;  %v49_v24 = vld [vmem:[%s924_s0 + $0x18] sm:$0xff]  ;;  %v640_v28 = vpack.c.bf16 %v75_v13, %v74_v12  ;;  %v642_v35 = vpack.c.bf16 %v93_v22, %v92_v21  ;;  %v769_v22 = vmov 0  }
  0x2a   :  { %633 = vmatpush3.bf16.msra.mxu0 %v632_v63  ;;  %v47_v18 = vld [vmem:[%s924_s0 + $0x8] sm:$0xff]  ;;  %v124_v25 = vld [vmem:[#allocation3 + $0x1f0] sm:$0xff]  ;;  %v125_v26 = vld [vmem:[#allocation3 + $0x1f8] sm:$0xff]  ;;  %v672_v34 = vpack.c.bf16 %v107_v17, %v106_v14  ;;  %710 = vset.pattern.permute.xlu0 %v769_v22 }
  0x2b   :  { %635 = vmatprep.subr.bf16.mxu0 %v634_v1  ;;  %v51_v19 = vld [vmem:[%s925_s1 + $0x8] sm:$0xff]  ;;  %v53_v27 = vld [vmem:[%s925_s1 + $0x18] sm:$0xff]  ;;  %v46_v31 = vld [vmem:[%s924_s0] sm:$0xff]  ;;  %v674_v39 = vpack.c.bf16 %v125_v26, %v124_v25 }
  0x2c   :  { %665 = vmatpush3.bf16.msra.mxu1 %v664_v0  ;;  %v55_v23 = vsub.f32 %v47_v18, %v51_v19  ;;  %v76_v29 = vld [vmem:[#allocation3 + $0x70] sm:$0xff]  ;;  %v50_v32 = vld [vmem:[%s925_s1] sm:$0xff]  ;;  %v57_v33 = vsub.f32 %v49_v24, %v53_v27  ;;  %v275_v48 = vld [vmem:[%s928_s4 + $0x8] sm:$0xff] }
  0x2d   :  { %667 = vmatprep.subr.bf16.mxu1 %v666_v5  ;;  %v77_v36 = vld [vmem:[#allocation3 + $0x78] sm:$0xff]  ;;  %v48_v37 = vld [vmem:[%s924_s0 + $0x10] sm:$0xff]  ;;  %v54_v43 = vsub.f32 %v46_v31, %v50_v32  ;;  %v279_v57 = vld [vmem:[%s928_s4 + $0x28] sm:$0xff] }
  0x2e   :  { %637 = vmatpush3.bf16.msra.mxu0 %v636_v11  ;;  %v59_v30 = vmul.f32 %v55_v23, %v55_v23  ;;  %v52_v38 = vld [vmem:[%s925_s1 + $0x10] sm:$0xff]  ;;  %v109_v41 = vld [vmem:[#allocation3 + $0x178] sm:$0xff]  ;;  %v61_v42 = vmul.f32 %v57_v33, %v57_v33  ;;  %v644_v44 = vpack.c.bf16 %v77_v36, %v76_v29  ;;  %v283_v63 = vld [vmem:[%s928_s4 + $0x48] sm:$0xff] }
  0x2f   :  { %639 = vmatprep.subr.bf16.mxu0 %v638_v16  ;;  %v108_v40 = vld [vmem:[#allocation3 + $0x170] sm:$0xff]  ;;  %v56_v45 = vsub.f32 %v48_v37, %v52_v38  ;;  %v274_v47 = vld [vmem:[%s928_s4] sm:$0xff]  ;;  %v58_v49 = vmul.f32 %v54_v43, %v54_v43  ;;  %v287_v5 = vld [vmem:[%s928_s4 + $0x68] sm:$0xff] }
  0x30   :  { %669 = vmatpush3.bf16.msra.mxu1 %v668_v15  ;;  %197 = vmatprep.mubr.f32.mxu0 %v59_v30  ;;  %v676_v46 = vpack.c.bf16 %v109_v41, %v108_v40  ;;  %v679_v51 = vpack.c.bf16 %v275_v48, %v274_v47  ;;  %v276_v53 = vld [vmem:[%s928_s4 + $0x10] sm:$0xff]  ;;  %v277_v54 = vld [vmem:[%s928_s4 + $0x18] sm:$0xff]  ;;  %v278_v56 = vld [vmem:[%s928_s4 + $0x20] sm:$0xff] }
  0x31   :  { %671 = vmatprep.subr.bf16.mxu1 %v670_v20  ;;  %267 = vmatprep.mubr.f32.mxu1 %v61_v42  ;;  %v60_v50 = vmul.f32 %v56_v45, %v56_v45  ;;  %v682_v55 = vpack.c.bf16 %v277_v54, %v276_v53  ;;  %v685_v58 = vpack.c.bf16 %v279_v57, %v278_v56  ;;  %v280_v59 = vld [vmem:[%s928_s4 + $0x30] sm:$0xff]  ;;  %v281_v60 = vld [vmem:[%s928_s4 + $0x38] sm:$0xff]  ;;  %v282_v62 = vld [vmem:[%s928_s4 + $0x40] sm:$0xff] }
  0x32   :  { %641 = vmatpush3.bf16.msra.mxu0 %v640_v28  ;;  %v688_v61 = vpack.c.bf16 %v281_v60, %v280_v59  ;;  %v691_v0 = vpack.c.bf16 %v283_v63, %v282_v62  ;;  %v284_v1 = vld [vmem:[%s928_s4 + $0x50] sm:$0xff]  ;;  %v285_v2 = vld [vmem:[%s928_s4 + $0x58] sm:$0xff]  ;;  %v286_v4 = vld [vmem:[%s928_s4 + $0x60] sm:$0xff] }
  0x33   :  { %643 = vmatprep.subr.bf16.mxu0 %v642_v35  ;;  %v694_v3 = vpack.c.bf16 %v285_v2, %v284_v1  ;;  %v697_v6 = vpack.c.bf16 %v287_v5, %v286_v4  ;;  %v288_v7 = vld [vmem:[%s928_s4 + $0x70] sm:$0xff]  ;;  %v289_v8 = vld [vmem:[%s928_s4 + $0x78] sm:$0xff]  ;;  %v479_v12 = vld [vmem:[%s927_s3] ss:$0 sm:$0xff] }
  0x34   :  { %673 = vmatpush3.bf16.msra.mxu1 %v672_v34  ;;  %v700_v9 = vpack.c.bf16 %v289_v8, %v288_v7  ;;  %v481_v21 = vld [vmem:[#allocation2] ss:$0 sm:$0xff] }
  0x35   :  { %675 = vmatprep.subr.bf16.mxu1 %v674_v39  ;;  %376 = vperm.xlu0 %710, %v481_v21   ;;  %v480_v23 = vld [vmem:[%s929_s5] ss:$0 sm:$0xff]  ;;  %s770_s5 = smov [#allocation6]  }
  0x36   :  { %645 = vmatpush3.bf16.msra.mxu0 %v644_v44  ;;  %v368_v28 = vld [vmem:[%s930_s6] sm:$0xff]  ;;  %s470_s2 = sshll.u32 %s770_s5, 4  ;;  %s471_s2 = int_to_ptr.vmem [resolvable:$true] %s470_s2 }
  0x37   :  { %678 = vmatprep.subr.bf16.mxu0 %v766_v52  ;;  %s737_s20 = scalar_lea.vmem %s471_s2, 128  ;;  %p742_p9 = scmp.lt.s32.totalorder %s471_s2, %s471_s2 }
  0x38   :  { %677 = vmatpush3.bf16.msra.mxu1 %v676_v46  ;;  %p738_p8 = scmp.ne.s32.totalorder %s471_s2, %s737_s20  ;;  %p743_p10 = scmp.lt.s32.totalorder %s737_s20, %s737_s20 }
  0x39   :  { %198 = vmatmul.mubr.f32.vlgmr.msra.gmra.mrb[0].mxu0 %v58_v49  ;;  %609 = vmatprep.subr.mxu1 %v768_v10 }
  0x3a   :  { %680 = vmatpush3.bf16.msra.mxu0 %v679_v51  ;;  %606 = vmatprep.mubr.msk.f32.mxu0 %vm767_vm0, %v768_v10  ;;  %p744_p11 = por %p743_p10, %p742_p9 }
  0x3b   :  { %268 = vmatmul.mubr.f32.vlgmr.msra.gmra.mrb[0].mxu1 %v60_v50  ;;  %681 = vmatprep.subr.bf16.mxu0 %v766_v52 }
  0x3c   :  { %611 = vmatprep.mubr.msk.f32.mxu1 %vm767_vm0, %v768_v10  ;;  %p745_p12 = pnand %p744_p11, %p738_p8 }
  0x3e   :  { %683 = vmatpush3.bf16.msra.mxu0 %v682_v55 }
  0x3f   :  { %684 = vmatprep.subr.bf16.mxu0 %v766_v52 }
  0x42   :  { %686 = vmatpush3.bf16.msra.mxu0 %v685_v58 }
  0x43   :  { %687 = vmatprep.subr.bf16.mxu0 %v766_v52 }
  0x46   :  { %689 = vmatpush3.bf16.msra.mxu0 %v688_v61 }
  0x47   :  { %690 = vmatprep.subr.bf16.mxu0 %v766_v52 }
  0x4a   :  { %692 = vmatpush3.bf16.msra.mxu0 %v691_v0 }
  0x4b   :  { %693 = vmatprep.subr.bf16.mxu0 %v766_v52 }
  0x4e   :  { %695 = vmatpush3.bf16.msra.mxu0 %v694_v3 }
  0x4f   :  { %696 = vmatprep.subr.bf16.mxu0 %v766_v52 }
  0x52   :  { %698 = vmatpush3.bf16.msra.mxu0 %v697_v6 }
  0x53   :  { %699 = vmatprep.subr.bf16.mxu0 %v766_v52 }
  0x56   :  { %701 = vmatpush3.bf16.msra.mxu0 %v700_v9 }
  0xb4   :  { %v377_v29 = vpop.permute.xlu0 %376 }
 0x10c   :  { %v517_v11 = vpop.f32.mrb[0].mxu0 }
 0x10d   :  { %v518_v13 = vpop.f32.mrb[1].mxu0 }
 0x10e   :  { %v552_v14 = vpop.f32.mrb[0].mxu1  ;;  %v519_v15 = vadd.f32 %v518_v13, %v517_v11 }
 0x10f   :  { %v553_v16 = vpop.f32.mrb[1].mxu1 }
 0x110   :  { %v554_v17 = vadd.f32 %v553_v16, %v552_v14  ;;  %v200_v18 = vadd.f32 %v519_v15, %v479_v12 }
 0x112   :  { %v270_v19 = vadd.f32 %v554_v17, %v200_v18 }
 0x114   :  { %v273_v20 = vmax.f32 %v270_v19, 0.0 }
 0x116   :  { %607 = vmatmul.mubr.f32.vlgmr.msra.gmra.mrb[2].mxu0 %v273_v20 }
 0x1e9   :  { %v363_v24 = vpop.f32.mrb[2].mxu0 }
 0x1ea   :  { %v364_v25 = vadd.f32 %v480_v23, %v363_v24  ;;  %v608_v26 = vpop.f32.mrb[3].mxu0 }
 0x1ec   :  { %v367_v27 = vmax.f32 %v364_v25, 0.0 }
 0x1ee   :  { %610 = vmatpush3.xpose.msk.msra.mxu1 %vm379_vm1, %v367_v27 }
 0x1f1   :  { %612 = vmatmul.mubr.msk.f32.vlgmr.msra.gmra.mrb[2].mxu1 %vm379_vm1, %v368_v28 }
 0x2c4   :  { %v452_v30 = vpop.f32.mrb[2].mxu1 }
 0x2c5   :  { %v453_v31 = vadd.f32 %v452_v30, %v377_v29  ;;  %v613_v32 = vpop.f32.mrb[3].mxu1 }
 0x2c7   :  { %v484_v33 = vmul.f32 -1.442695, %v453_v31 }
 0x2c9   :  { %711 = vpow2.f32 %v484_v33 }
 0x2d3   :  { %v712_v34 = vpop.eup %711 }
 0x2d4   :  { %v459_v35 = vadd.f32 1.0, %v712_v34 }
 0x2d6   :  { %713 = vrcp.f32 %v459_v35 }
 0x2e0   :  { %v714_v36 = vpop.eup %713 }
 0x2e1   :  { %463 = vst.msk [vmem:[#allocation6] sm:$0xff] %vm462_vm2, %v714_v36 }
 0x2e2   :  { %748 = shalt.err (!%p745_p12)
}
 0x2e3   :  { %s749_s22 = scalar_lea.hbm %s932_s8, 128 }
 0x2e4   :  { %p750_p13 = scmp.ne.s32.totalorder %s932_s8, %s749_s22  ;;  %p753_p0 = scmp.lt.u32.totalorder %s749_s22, %s932_s8 }
 0x2e6   :  { %p755_p1 = pnand %p753_p0, %p750_p13 }
 0x2e8   :  { %758 = shalt.err (!%p755_p1)
}
 0x2e9   :  { %473 = dma.vmem_to_hbm [thread:$0]  %s471_s2, 128, %s932_s8, [#allocation5]  }
 0x2ea   :  { %761 = dma.done.wait [#allocation5], 128  }
 0x2eb   :  { %762 = vsyncadd [#allocation5], 4294967168 }
 0x2ec   :  { %477 = vsyncpa [#allocation4], 1 }
 0x2ed   :  { %478 = vsyncpa [#allocation5], 1 }

</bundles_post_ra>
